<compile_context>
chip_gen: v6e
topology: v6e:2x2x1
jax: 0.10.0
libtpu: 0.0.40
codegen_flags: <defaults>
</compile_context>

<pallas_src>
import functools

import jax
import jax.numpy as jnp
from jax.experimental import pallas as pl
from jax.experimental.pallas import tpu as pltpu


_SMALL_PATH_BYTES = 1 * 1024 * 1024     # below this, one fused single-block kernel


def _round_up(x, m):
    return (x + m - 1) // m * m


def _vmem_params():
    """(vmem_limit_bytes, pipeline_budget_bytes, max_t_tile) per generation."""
    vmem_cap = None
    try:
        info = pltpu.get_tpu_info()
        vmem_cap = int(getattr(info, "vmem_capacity_bytes", 0)) or None
    except Exception:
        vmem_cap = None
    if vmem_cap is None:
        vmem_cap = 64 * 1024 * 1024                 # assume the smallest (v7x-like)
    if vmem_cap >= 96 * 1024 * 1024:                # v5e / v6e: 128 MiB physical
        return 64 * 1024 * 1024, 48 * 1024 * 1024, 2048
    return 32 * 1024 * 1024, 20 * 1024 * 1024, 1024  # v7x: 64 MiB physical


# ----------------------------------------------------------------------------
# Single-block fused fast path (tiny inputs).
# ----------------------------------------------------------------------------
def _featmag_small_kernel(pos_ref, neg_ref, out_ref, *, margin, n_pos, n_neg):
    pos = pos_ref[...].astype(jnp.float32)              # (B, Tp, D)
    neg = neg_ref[...].astype(jnp.float32)              # (B, Tn, D)

    mean_pos = jnp.sum(pos, axis=1) * jnp.float32(1.0 / n_pos)   # (B, D)
    mean_neg = jnp.sum(neg, axis=1) * jnp.float32(1.0 / n_neg)

    norm_pos = jnp.sqrt(jnp.sum(mean_pos * mean_pos, axis=-1, keepdims=True))
    norm_neg = jnp.sqrt(jnp.sum(mean_neg * mean_neg, axis=-1, keepdims=True))

    loss_act = jnp.maximum(jnp.float32(margin) - norm_pos, 0.0)
    sq = (loss_act + norm_neg) ** 2                      # (B, 1)
    out_ref[0, 0] = jnp.sum(sq) / jnp.float32(sq.shape[0])


def _featmag_small(pos, neg, margin, n_pos, n_neg):
    kernel = functools.partial(
        _featmag_small_kernel, margin=float(margin), n_pos=n_pos, n_neg=n_neg)
    b = pos.shape[0]
    out = pl.pallas_call(
        kernel,
        out_shape=jax.ShapeDtypeStruct((1, 1), jnp.float32),
        in_specs=[
            pl.BlockSpec(memory_space=pltpu.MemorySpace.VMEM),
            pl.BlockSpec(memory_space=pltpu.MemorySpace.VMEM),
        ],
        out_specs=pl.BlockSpec(memory_space=pltpu.MemorySpace.SMEM),
        compiler_params=pltpu.CompilerParams(vmem_limit_bytes=32 * 1024 * 1024),
        cost_estimate=pl.CostEstimate(
            flops=int(2 * (pos.size + neg.size) + 6 * b * pos.shape[-1]),
            transcendentals=int(2 * b),
            bytes_accessed=int(pos.nbytes + neg.nbytes + 4),
        ),
    )(pos, neg)
    return out[0, 0]


# ----------------------------------------------------------------------------
# Streaming per-batch sum over T (one pallas_call per input tensor).
#   grid = (s_split [parallel], B tiles [parallel], T tiles [arbitrary])
#   output (num_s, B, D) f32: per-split per-batch sums; block resident across
#   the T axis acts as the accumulator (init at ti == 0).
# ----------------------------------------------------------------------------
def _sum_over_t_kernel(x_ref, out_ref, *, t_valid, t_tile, num_t_split, needs_mask):
    ti = pl.program_id(2)

    @pl.when(ti == 0)
    def _():
        out_ref[...] = jnp.zeros_like(out_ref)

    # Cast one tile at a time to f32; per-tile cross-sublane sum is expected to
    # hide under the HBM DMA.  (Sublane-resident accumulation is a possible
    # further micro-opt if a v7x bundle dump shows it exposed.)
    tile = x_ref[...].astype(jnp.float32)                # (b_tile, t_tile, d)
    if needs_mask:
        g = pl.program_id(0) * num_t_split + ti          # global T-tile index
        valid = t_valid - g * t_tile                     # rows of this tile in range
        row = jax.lax.broadcasted_iota(jnp.int32, tile.shape, 1)
        tile = jnp.where(row < valid, tile, jnp.float32(0.0))
    out_ref[...] += jnp.sum(tile, axis=1)[None, :, :]


def _per_batch_sums(x, budget, vmem_limit, max_t_tile, t_tile_cap=None):
    """Returns f32 (B, D) sum of x over axis 1, streamed through VMEM."""
    b, t, d = x.shape
    itemsize = x.dtype.itemsize

    # Native sublane multiple of the storage dtype (8 f32, 16 bf16, 32 int8/fp8).
    sub = max(8, 32 // max(1, itemsize))

    # B tile: full batch when small (block dim == full array dim is legal),
    # otherwise a multiple of 8; partial trailing B blocks are handled by the
    # DMA clipping (no zero rows are ever streamed from HBM).
    b_tile = b if b <= 8 else 8
    num_b = -(-b // b_tile)

    # T tile: biggest multiple of `sub` such that one double-buffered input
    # block plus the resident f32 output block fit the per-generation budget.
    out_block_bytes = 2 * b_tile * d * 4
    in_per_t_bytes = 2 * b_tile * d * itemsize
    avail = max(budget - out_block_bytes, in_per_t_bytes * sub)
    t_tile = (avail // in_per_t_bytes) // sub * sub
    t_tile = max(sub, min(t_tile, max_t_tile, _round_up(t, sub)))
    if t_tile_cap is not None:
        t_tile = max(sub, min(t_tile, _round_up(int(t_tile_cap), sub)))

    num_t_total = -(-t // t_tile)
    # v7x: if the whole batch is a single B tile, split the T reduction across
    # a size-2 parallel axis so both TensorCores stream HBM.  On 1-TC chips the
    # extra axis just runs serially (negligible cost).
    num_s = 2 if (num_b == 1 and num_t_total >= 2) else 1
    num_t_split = -(-num_t_total // num_s)
    needs_mask = (t % t_tile != 0) or (num_s * num_t_split != num_t_total)

    # TODO(synk): for pathologically wide D (where even the minimal tile blows
    # the budget) add a D grid axis with per-D-tile partial sums; here we just
    # raise the scoped VMEM limit to cover the minimal tile.
    required = 2 * b_tile * t_tile * d * itemsize + out_block_bytes + (2 << 20)
    vmem_limit = max(vmem_limit, required)

    kernel = functools.partial(
        _sum_over_t_kernel, t_valid=t, t_tile=t_tile,
        num_t_split=num_t_split, needs_mask=needs_mask)

    def in_map(si, bi, ti):
        g = si * num_t_split + ti
        # Clamp fully out-of-range tiles (from the s-split rounding) onto the
        # last valid tile; their contribution is masked to zero in-kernel.
        return (bi, jnp.minimum(g, num_t_total - 1), 0)

    partials = pl.pallas_call(
        kernel,
        out_shape=jax.ShapeDtypeStruct((num_s, b, d), jnp.float32),
        grid_spec=pltpu.PrefetchScalarGridSpec(
            num_scalar_prefetch=0,
            grid=(num_s, num_b, num_t_split),
            in_specs=[pl.BlockSpec((b_tile, t_tile, d), in_map)],
            out_specs=pl.BlockSpec((1, b_tile, d), lambda si, bi, ti: (si, bi, 0)),
        ),
        compiler_params=pltpu.CompilerParams(
            dimension_semantics=("parallel", "parallel", "arbitrary"),
            vmem_limit_bytes=int(vmem_limit),
        ),
        cost_estimate=pl.CostEstimate(
            flops=int(2 * x.size),
            transcendentals=0,
            bytes_accessed=int(x.nbytes + num_s * b * d * 4),
        ),
    )(x)
    return jnp.sum(partials, axis=0)                     # (B, D) f32


# ----------------------------------------------------------------------------
# Public wrapper.
# ----------------------------------------------------------------------------
def featmag_forward(feat_pos, feat_neg, margin, w_scale=1.0, zero_idx=None,
                    force_tiled=False, t_tile_cap=None):
    """JAX/Pallas equivalent of FeatMag.forward.

    feat_pos: (B, T_pos, D), feat_neg: (B, T_neg, D).
    zero_idx (optional): pair of static Python ints -> truncate the T axes
    (matches feat[:, :zero_idx, :]).
    """
    # TODO(synk): zero_idx must be static Python ints; a traced/dynamic index
    # would need a masked-mean variant instead of a slice.
    if zero_idx is not None:
        feat_pos = feat_pos[:, : int(zero_idx[0]), :]
        feat_neg = feat_neg[:, : int(zero_idx[1]), :]

    b, n_pos, d = feat_pos.shape
    bn, n_neg, dn = feat_neg.shape
    if b != bn or d != dn:
        raise ValueError("feat_pos / feat_neg must share batch and feature dims")

    total_bytes = feat_pos.nbytes + feat_neg.nbytes
    if not force_tiled and total_bytes <= _SMALL_PATH_BYTES:
        loss_um = _featmag_small(feat_pos, feat_neg, margin, n_pos, n_neg)
    else:
        vmem_limit, budget, max_t_tile = _vmem_params()
        sum_pos = _per_batch_sums(feat_pos, budget, vmem_limit, max_t_tile, t_tile_cap)
        sum_neg = _per_batch_sums(feat_neg, budget, vmem_limit, max_t_tile, t_tile_cap)
        # Tiny O(B*D) epilogue in plain JAX.
        mean_pos = sum_pos * jnp.float32(1.0 / n_pos)
        mean_neg = sum_neg * jnp.float32(1.0 / n_neg)
        norm_pos = jnp.sqrt(jnp.sum(mean_pos * mean_pos, axis=-1))
        norm_neg = jnp.sqrt(jnp.sum(mean_neg * mean_neg, axis=-1))
        loss_act = jnp.maximum(jnp.float32(margin) - norm_pos, 0.0)
        loss_um = jnp.mean((loss_act + norm_neg) ** 2)
    return loss_um / jnp.float32(w_scale)


def _featmag_reference(feat_pos, feat_neg, margin, w_scale=1.0):
    mean_pos = jnp.mean(feat_pos.astype(jnp.float32), axis=1)
    mean_neg = jnp.mean(feat_neg.astype(jnp.float32), axis=1)
    loss_act = jnp.maximum(margin - jnp.linalg.norm(mean_pos, axis=1), 0.0)
    loss_bkg = jnp.linalg.norm(mean_neg, axis=1)
    return jnp.mean((loss_act + loss_bkg) ** 2) / w_scale


if __name__ == "__main__":
    key = jax.random.PRNGKey(0)
    k1, k2, k3, k4, k5, k6 = jax.random.split(key, 6)

    margin = 100.0
    w_scale = 1.0

    # --- tiny shapes -> single-block fused path -------------------------------
    feat_pos = jax.random.normal(k1, (2, 8, 32), dtype=jnp.float32)
    feat_neg = jax.random.normal(k2, (2, 8, 32), dtype=jnp.float32)
    out_small = jax.block_until_ready(featmag_forward(feat_pos, feat_neg, margin, w_scale))
    ref_small = _featmag_reference(feat_pos, feat_neg, margin, w_scale)
    assert jnp.allclose(out_small, ref_small, rtol=1e-5, atol=1e-5), (out_small, ref_small)

    # --- zero_idx (static truncation) -----------------------------------------
    out_zi = jax.block_until_ready(
        featmag_forward(feat_pos, feat_neg, margin, w_scale, zero_idx=(6, 5)))
    ref_zi = _featmag_reference(feat_pos[:, :6], feat_neg[:, :5], margin, w_scale)
    assert jnp.allclose(out_zi, ref_zi, rtol=1e-5, atol=1e-5), (out_zi, ref_zi)

    # --- forced streaming path: asymmetric / unaligned T, unaligned B & D,
    #     tail masking, and the size-2 T-split parallel axis ---------------------
    feat_pos2 = jax.random.normal(k3, (3, 37, 200), dtype=jnp.float32)
    feat_neg2 = jax.random.normal(k4, (3, 11, 200), dtype=jnp.float32)
    out_tiled = jax.block_until_ready(
        featmag_forward(feat_pos2, feat_neg2, margin, w_scale,
                        force_tiled=True, t_tile_cap=16))
    ref_tiled = _featmag_reference(feat_pos2, feat_neg2, margin, w_scale)
    assert jnp.allclose(out_tiled, ref_tiled, rtol=1e-5, atol=1e-5), (out_tiled, ref_tiled)

    # --- bf16 inputs -> 16-row sublane tiles, in-kernel f32 accumulation -------
    feat_pos3 = jax.random.normal(k5, (4, 33, 96), dtype=jnp.float32).astype(jnp.bfloat16)
    feat_neg3 = jax.random.normal(k6, (4, 21, 96), dtype=jnp.float32).astype(jnp.bfloat16)
    out_bf16 = jax.block_until_ready(
        featmag_forward(feat_pos3, feat_neg3, margin, w_scale,
                        force_tiled=True, t_tile_cap=16))
    ref_bf16 = _featmag_reference(feat_pos3, feat_neg3, margin, w_scale)
    assert jnp.allclose(out_bf16, ref_bf16, rtol=1e-4, atol=1e-4), (out_bf16, ref_bf16)

    print("KERNEL_OK")
</pallas_src>

<mosaic_0001>
module attributes {stable_mosaic.version = 11 : i64} {
  func.func @_featmag_small_kernel(%arg0: memref<2x8x32xf32, #tpu.memory_space<vmem>>, %arg1: memref<2x8x32xf32, #tpu.memory_space<vmem>>, %arg2: memref<1x1xf32, #tpu.memory_space<smem>>) attributes {dimension_semantics = [], scalar_prefetch = 0 : i64, scratch_operands = 0 : i64, tpu.core_type = #tpu.core_type<tc>} {
    %c0 = arith.constant 0 : index
    %c0_0 = arith.constant 0 : index
    %c0_1 = arith.constant 0 : index
    %0 = vector.load %arg0[%c0, %c0_0, %c0_1] : memref<2x8x32xf32, #tpu.memory_space<vmem>>, vector<2x8x32xf32>
    %c0_2 = arith.constant 0 : index
    %c0_3 = arith.constant 0 : index
    %c0_4 = arith.constant 0 : index
    %1 = vector.load %arg1[%c0_2, %c0_3, %c0_4] : memref<2x8x32xf32, #tpu.memory_space<vmem>>, vector<2x8x32xf32>
    %cst = arith.constant dense<0.000000e+00> : vector<2x32xf32>
    %2 = vector.multi_reduction <add>, %0, %cst [1] : vector<2x8x32xf32> to vector<2x32xf32>
    %cst_5 = arith.constant 1.250000e-01 : f32
    %3 = vector.broadcast %cst_5 : f32 to vector<2x32xf32>
    %4 = arith.mulf %2, %3 : vector<2x32xf32>
    %cst_6 = arith.constant dense<0.000000e+00> : vector<2x32xf32>
    %5 = vector.multi_reduction <add>, %1, %cst_6 [1] : vector<2x8x32xf32> to vector<2x32xf32>
    %cst_7 = arith.constant 1.250000e-01 : f32
    %6 = vector.broadcast %cst_7 : f32 to vector<2x32xf32>
    %7 = arith.mulf %5, %6 : vector<2x32xf32>
    %8 = arith.mulf %4, %4 : vector<2x32xf32>
    %cst_8 = arith.constant dense<0.000000e+00> : vector<2xf32>
    %9 = vector.multi_reduction <add>, %8, %cst_8 [1] : vector<2x32xf32> to vector<2xf32>
    %10 = vector.shape_cast %9 : vector<2xf32> to vector<2x1xf32>
    %11 = math.sqrt %10 : vector<2x1xf32>
    %12 = arith.mulf %7, %7 : vector<2x32xf32>
    %cst_9 = arith.constant dense<0.000000e+00> : vector<2xf32>
    %13 = vector.multi_reduction <add>, %12, %cst_9 [1] : vector<2x32xf32> to vector<2xf32>
    %14 = vector.shape_cast %13 : vector<2xf32> to vector<2x1xf32>
    %15 = math.sqrt %14 : vector<2x1xf32>
    %cst_10 = arith.constant 1.000000e+02 : f32
    %16 = vector.broadcast %cst_10 : f32 to vector<2x1xf32>
    %17 = arith.subf %16, %11 : vector<2x1xf32>
    %cst_11 = arith.constant 0.000000e+00 : f32
    %18 = vector.broadcast %cst_11 : f32 to vector<2x1xf32>
    %19 = arith.maximumf %17, %18 : vector<2x1xf32>
    %20 = arith.addf %19, %15 : vector<2x1xf32>
    %21 = arith.mulf %20, %20 : vector<2x1xf32>
    %22 = vector.shape_cast %21 : vector<2x1xf32> to vector<1x2x1xf32>
    %cst_12 = arith.constant dense<0.000000e+00> : vector<1xf32>
    %23 = vector.multi_reduction <add>, %22, %cst_12 [1, 2] : vector<1x2x1xf32> to vector<1xf32>
    %24 = vector.shape_cast %23 : vector<1xf32> to vector<1x1x1xf32>
    %25 = vector.extract %24[0, 0, 0] : f32 from vector<1x1x1xf32>
    %cst_13 = arith.constant 2.000000e+00 : f32
    %26 = arith.divf %25, %cst_13 : f32
    %c0_14 = arith.constant 0 : index
    %c0_15 = arith.constant 0 : index
    %27 = memref.load %arg2[%c0_14, %c0_15] : memref<1x1xf32, #tpu.memory_space<smem>>
    memref.store %26, %arg2[%c0_14, %c0_15] : memref<1x1xf32, #tpu.memory_space<smem>>
    return
  }
}

</mosaic_0001>

<bundles_post_ra>
// kernel: tpu_custom_call.1
= control target key start
LH: loop header
LB: loop body
LE: loop exit
PB: predicated region body
PF: predicated region fallthrough
CT: control target
= control target key end

     0   :  { %7 = vsyncpa [#allocation3], 0  ;;  %s240_s0 = inlined_call_operand.hbm [shape: f32[2,8,32], index: 0, kind: input, shape index: {}]   ;;  %s241_s1 = inlined_call_operand.hbm [shape: f32[2,8,32], index: 1, kind: input, shape index: {}]   ;;  %s242_s2 = inlined_call_operand.hbm [shape: f32[1,1], index: 2, kind: output, shape index: {}]  }
   0x1   :  { %8 = vsyncpa [#allocation6], 0 }
   0x2   :  { %9 = vsyncpa [#allocation4], 0  ;;  %s211_s9 = smov [#allocation2]  }
   0x3   :  { %s15_s10 = sshll.u32 %s211_s9, 4  ;;  %s16_s10 = int_to_ptr.vmem [resolvable:$true] %s15_s10 }
   0x4   :  { %s165_s11 = scalar_lea.vmem %s16_s10, 256  ;;  %p170_p1 = scmp.lt.s32.totalorder %s16_s10, %s16_s10 }
   0x5   :  { %p166_p0 = scmp.ne.s32.totalorder %s16_s10, %s165_s11  ;;  %p171_p2 = scmp.lt.s32.totalorder %s165_s11, %s165_s11 }
   0x7   :  { %p172_p3 = por %p171_p2, %p170_p1 }
   0x9   :  { %p173_p4 = pnand %p172_p3, %p166_p0 }
   0xb   :  { %176 = shalt.err (!%p173_p4)
}
   0xc   :  { %s212_s12 = smov 128   ;;  %s213_s13 = smov 8  }
   0xd   :  { %21 = dma.hbm_to_vmem [thread:$0]  %s240_s0, 256, %s16_s10, [#allocation3], %s212_s12, %s212_s12, %s213_s13  }
   0xe   :  { %s214_s16 = smov [#allocation5]  }
   0xf   :  { %s27_s17 = sshll.u32 %s214_s16, 4  ;;  %s28_s17 = int_to_ptr.vmem [resolvable:$true] %s27_s17 }
  0x10   :  { %s185_s18 = scalar_lea.vmem %s28_s17, 256  ;;  %p190_p6 = scmp.lt.s32.totalorder %s28_s17, %s28_s17 }
  0x11   :  { %p186_p5 = scmp.ne.s32.totalorder %s28_s17, %s185_s18  ;;  %p191_p7 = scmp.lt.s32.totalorder %s185_s18, %s185_s18 }
  0x13   :  { %p192_p8 = por %p191_p7, %p190_p6 }
  0x15   :  { %p193_p9 = pnand %p192_p8, %p186_p5 }
  0x17   :  { %196 = shalt.err (!%p193_p9)
}
  0x18   :  { %33 = dma.hbm_to_vmem [thread:$0]  %s241_s1, 256, %s28_s17, [#allocation6], %s212_s12, %s212_s12, %s213_s13  }
  0x19   :  { %205 = dma.done.wait [#allocation3], 256  }
  0x1a   :  { %206 = vsyncadd [#allocation3], 4294967040 }
  0x1b   :  { %207 = dma.done.wait [#allocation6], 256  }
  0x1c   :  { %208 = vsyncadd [#allocation6], 4294967040  ;;  %vm44_vm0 = vcmask 261120   ;;  %v40_v0 = vld [vmem:[#allocation2] sm:$0xff]  ;;  %v41_v1 = vld [vmem:[#allocation2 + $0x8] sm:$0xff]  ;;  %vm81_vm1 = vcmask 1041409  }
  0x1d   :  { %v42_v2 = vld [vmem:[#allocation5] sm:$0xff]  ;;  %v45_v3 = vsel %vm44_vm0, %v40_v0, 0.0  ;;  %v52_v4 = vsel %vm44_vm0, %v41_v1, 0.0  ;;  %v43_v5 = vld [vmem:[#allocation5 + $0x8] sm:$0xff]  ;;  %vm84_vm2 = vcmask 254976   ;;  %vm115_vm7 = vcmask 1024  }
  0x1e   :  { %v61_v6 = vsel %vm44_vm0, %v42_v2, 0.0  ;;  %v46_v7 = vrot.slane %v45_v3, 4  ;;  %v53_v8 = vrot.slane %v52_v4, 4  ;;  %v68_v10 = vsel %vm44_vm0, %v43_v5, 0.0  ;;  %s215_s21 = smov [#allocation7]  }
  0x1f   :  { %v62_v9 = vrot.slane %v61_v6, 4  ;;  %v69_v11 = vrot.slane %v68_v10, 4 }
  0x20   :  { %v47_v12 = vadd.f32 %v46_v7, %v45_v3  ;;  %v54_v13 = vadd.f32 %v53_v8, %v52_v4 }
  0x21   :  { %v63_v14 = vadd.f32 %v62_v9, %v61_v6  ;;  %v70_v15 = vadd.f32 %v69_v11, %v68_v10 }
  0x22   :  { %v48_v16 = vrot.slane %v47_v12, 2  ;;  %v55_v17 = vrot.slane %v54_v13, 2 }
  0x23   :  { %v64_v18 = vrot.slane %v63_v14, 2  ;;  %v71_v19 = vrot.slane %v70_v15, 2 }
  0x24   :  { %v49_v20 = vadd.f32 %v48_v16, %v47_v12  ;;  %v56_v21 = vadd.f32 %v55_v17, %v54_v13 }
  0x25   :  { %v65_v22 = vadd.f32 %v64_v18, %v63_v14  ;;  %v72_v23 = vadd.f32 %v71_v19, %v70_v15 }
  0x26   :  { %v50_v24 = vrot.slane %v49_v20, 1  ;;  %v57_v25 = vrot.slane %v56_v21, 1 }
  0x27   :  { %v66_v26 = vrot.slane %v65_v22, 1  ;;  %v73_v27 = vrot.slane %v72_v23, 1 }
  0x28   :  { %v51_v28 = vadd.f32 %v50_v24, %v49_v20  ;;  %v58_v29 = vadd.f32 %v57_v25, %v56_v21 }
  0x29   :  { %v67_v30 = vadd.f32 %v66_v26, %v65_v22  ;;  %v74_v31 = vadd.f32 %v73_v27, %v72_v23 }
  0x2a   :  { %v59_v32 = vmul.f32 0.125, %v51_v28  ;;  %v60_v33 = vmul.f32 0.125, %v58_v29 }
  0x2b   :  { %v75_v34 = vmul.f32 0.125, %v67_v30  ;;  %v76_v35 = vmul.f32 0.125, %v74_v31 }
  0x2c   :  { %v77_v36 = vmul.f32 %v59_v32, %v59_v32  ;;  %v78_v37 = vmul.f32 %v60_v33, %v60_v33 }
  0x2d   :  { %v95_v38 = vmul.f32 %v75_v34, %v75_v34  ;;  %v96_v39 = vmul.f32 %v76_v35, %v76_v35 }
  0x2e   :  { %v82_v40 = vsel %vm81_vm1, %v78_v37, %v77_v36 }
  0x2f   :  { %v85_v41 = vsel %vm84_vm2, %v82_v40, 0.0  ;;  %v99_v42 = vsel %vm81_vm1, %v96_v39, %v95_v38 }
  0x30   :  { %86 = vadd.xlane.f32.xlu0 %v85_v41  ;;  %v101_v43 = vsel %vm84_vm2, %v99_v42, 0.0 }
  0x34   :  { %102 = vadd.xlane.f32.xlu0 %v101_v43 }
  0xb9   :  { %v87_v44 = vpop.xlane.xlu0 %86 }
  0xba   :  { %153 = vrsqrt.f32 %v87_v44  ;;  %vm90_vm3 = vcmp.eq.f32.partialorder %v87_v44, inf  ;;  %v93_v48 = vand.u32 2147483648, %v87_v44  ;;  %vm92_vm4 = vcmp.eq.f32.partialorder %v87_v44, 0.0 }
  0xbd   :  { %v103_v45 = vpop.xlane.xlu0 %102 }
  0xbe   :  { %155 = vrsqrt.f32 %v103_v45  ;;  %vm106_vm5 = vcmp.eq.f32.partialorder %v103_v45, inf  ;;  %v109_v54 = vand.u32 2147483648, %v103_v45  ;;  %vm108_vm6 = vcmp.eq.f32.partialorder %v103_v45, 0.0 }
  0xc7   :  { %v154_v46 = vpop.eup %153 }
  0xc8   :  { %v89_v47 = vmul.f32 %v154_v46, %v87_v44 }
  0xca   :  { %v91_v49 = vsel %vm90_vm3, %v87_v44, %v89_v47 }
  0xcb   :  { %v156_v50 = vpop.eup %155  ;;  %v94_v51 = vsel %vm92_vm4, %v93_v48, %v91_v49 }
  0xcc   :  { %v105_v52 = vmul.f32 %v156_v50, %v103_v45  ;;  %v111_v53 = vsub.f32 100.0, %v94_v51 }
  0xce   :  { %v107_v55 = vsel %vm106_vm5, %v103_v45, %v105_v52  ;;  %v112_v56 = vmax.f32 %v111_v53, 0.0 }
  0xcf   :  { %v110_v57 = vsel %vm108_vm6, %v109_v54, %v107_v55 }
  0xd0   :  { %v113_v58 = vadd.f32 %v112_v56, %v110_v57 }
  0xd2   :  { %v114_v59 = vmul.f32 %v113_v58, %v113_v58 }
  0xd4   :  { %v116_v60 = vsel %vm115_vm7, %v114_v59, 0.0 }
  0xd5   :  { %117 = vadd.xlane.f32.xlu1 %v116_v60 }
 0x15e   :  { %v118_v61 = vpop.xlane.xlu1 %117 }
 0x15f   :  { %v119_v62 = vrot.slane %v118_v61, 4 }
 0x161   :  { %v120_v63 = vadd.f32 %v119_v62, %v118_v61 }
 0x163   :  { %v121_v0 = vrot.slane %v120_v63, 2 }
 0x165   :  { %v122_v1 = vadd.f32 %v121_v0, %v120_v63 }
 0x167   :  { %v123_v2 = vrot.slane %v122_v1, 1 }
 0x169   :  { %v124_v3 = vadd.f32 %v123_v2, %v122_v1 }
 0x16b   :  { %146 = vpush %v124_v3 }
 0x19c   :  { %s147_s0 = spop %146 }
 0x19d   :  { %s128_s1 = smul.f32 0.5, %s147_s0 }
 0x19f   :  { %130 = sst [smem:[#allocation7]] %s128_s1 }
 0x1a0   :  { %138 = dma.smem_to_hbm %s215_s21, 16, %s242_s2, [#allocation4]  }
 0x1a1   :  { %209 = dma.done.wait [#allocation4], 16  }
 0x1a2   :  { %210 = vsyncadd [#allocation4], 4294967280 }
 0x1a3   :  { %142 = sfence }
 0x1a4   :  { %143 = vsyncpa [#allocation3], 1 }
 0x1a5   :  { %144 = vsyncpa [#allocation6], 1 }
 0x1a6   :  { %145 = vsyncpa [#allocation4], 1 }

</bundles_post_ra>
